<compile_context>
chip_gen: v6e
topology: v6e:2x2x1
jax: 0.10.0
libtpu: 0.0.40
codegen_flags: <defaults>
</compile_context>

<pallas_src>
import math
import functools

import jax
import jax.numpy as jnp
from jax.experimental import pallas as pl
from jax.experimental.pallas import tpu as pltpu


# ------------------------- slope table (host side) -------------------------
def _get_alibi_slopes(heads):
    """Mirrors AlibiPositionalBias._get_slopes."""
    def power_of_2(n):
        start = 2 ** (-(2 ** -(math.log2(n) - 3)))
        ratio = start
        return [start * ratio ** i for i in range(n)]

    if math.log2(heads).is_integer():
        return power_of_2(heads)
    closest = 2 ** math.floor(math.log2(heads))
    return power_of_2(closest) + power_of_2(2 * closest)[0::2][: heads - closest]


# ------------------------------- kernel -------------------------------------
def _alibi_add_kernel(slopes_ref, qk_ref, out_ref, *, seq_i, seq_j,
                      block_i, block_j):
    h_idx = pl.program_id(1)
    i_idx = pl.program_id(2)
    j_idx = pl.program_id(3)

    # Fold every scalar offset out of the vector path:
    #   bias[r, c] = -slope * |(c + c_off) - (r + r_off) - (J - I)|
    #              = neg_slope * |c - r + delta|
    neg_slope = -slopes_ref[h_idx]                       # SMEM scalar read
    delta = j_idx * block_j - i_idx * block_i - (seq_j - seq_i)

    rows = jax.lax.broadcasted_iota(jnp.int32, (block_i, block_j), 0)
    cols = jax.lax.broadcasted_iota(jnp.int32, (block_i, block_j), 1)
    dist = jnp.abs(cols - rows + delta).astype(jnp.float32)

    out_ref[0, 0] = (qk_ref[0, 0].astype(jnp.float32)
                     + neg_slope * dist).astype(out_ref.dtype)


# ---------------------------- tile selection ---------------------------------
def _choose_tiles(i, j, in_itemsize, out_itemsize):
    # Sublane packing: f32 -> 8 rows/vreg, bf16 -> 16, int8/fp8 -> 32.
    sub_min = {4: 8, 2: 16, 1: 32}.get(in_itemsize, 8)

    # One pipeline stage holds one input tile + one output tile; BlockSpec
    # double-buffers them, so live VMEM ~ 2x the (in + out) tile.  Budget the
    # (in + out) tile at <= 16 MiB -> live <= 32 MiB, which fits v7x's 64 MiB
    # physical VMEM with headroom and every other generation's scoped limit
    # once vmem_limit_bytes is raised below.
    max_elems = (16 << 20) // (in_itemsize + out_itemsize)

    # Prefer a fully contiguous row (block_j == J): one unstrided HBM burst per
    # row and fully lane-dense unmasked stores.  Only fall back to lane-dense
    # j-tiling for very long rows.
    if j * min(sub_min, i) <= max_elems:
        block_j = j
    else:
        block_j = next((c for c in (2048, 1024, 512, 256, 128)
                        if c < j and j % c == 0), j)

    # Largest power-of-two multiple of sub_min dividing I that fits the budget.
    block_i = None
    c = sub_min
    while c <= i:
        if i % c == 0 and c * block_j <= max_elems:
            block_i = c
        c *= 2
    if block_i is None:
        block_i = i   # full extent is always a legal block
        # TODO(synk): for huge I with no power-of-two divisor this full-extent
        # fallback can exceed the VMEM budget; such shapes would need a padded
        # (cdiv) grid with in-kernel masking.
    return block_i, block_j


# ------------------------------ wrapper --------------------------------------
def alibi_positional_bias(qk_dots, *, heads):
    """qk_dots: (B, H, I, J). Returns qk_dots + ALiBi bias.

    Output dtype follows torch promotion: sub-f32 inputs promote to f32
    (the bias is f32), f32 inputs stay f32.
    """
    b, h, i, j = qk_dots.shape

    slopes = jnp.asarray(_get_alibi_slopes(heads), dtype=jnp.float32)
    if h > heads:            # un-alibied heads -> zero bias (F.pad in torch)
        slopes = jnp.concatenate([slopes, jnp.zeros((h - heads,), jnp.float32)])
    elif h < heads:
        slopes = slopes[:h]

    out_dtype = jnp.result_type(qk_dots.dtype, jnp.float32)
    in_itemsize = jnp.dtype(qk_dots.dtype).itemsize
    out_itemsize = jnp.dtype(out_dtype).itemsize

    block_i, block_j = _choose_tiles(i, j, in_itemsize, out_itemsize)

    kernel = functools.partial(_alibi_add_kernel, seq_i=i, seq_j=j,
                               block_i=block_i, block_j=block_j)

    grid = (b, h, pl.cdiv(i, block_i), pl.cdiv(j, block_j))

    grid_spec = pltpu.PrefetchScalarGridSpec(
        num_scalar_prefetch=0,
        grid=grid,
        in_specs=[
            # whole slope table lives in SMEM for the duration of the kernel
            pl.BlockSpec(memory_space=pltpu.MemorySpace.SMEM),
            pl.BlockSpec((1, 1, block_i, block_j),
                         lambda bb, hh, ii, jj: (bb, hh, ii, jj)),
        ],
        out_specs=pl.BlockSpec((1, 1, block_i, block_j),
                               lambda bb, hh, ii, jj: (bb, hh, ii, jj)),
    )

    # Double-buffered in + out tiles, plus headroom for compiler scratch.
    live_vmem = 2 * block_i * block_j * (in_itemsize + out_itemsize)
    vmem_limit = int(max(32 << 20, live_vmem + (8 << 20)))   # <= 40 MiB

    # In-place elementwise add: alias the qk_dots HBM buffer with the output
    # whenever the dtypes match (inputs are [slopes, qk_dots] -> index 1).
    aliases = {1: 0} if jnp.dtype(out_dtype) == jnp.dtype(qk_dots.dtype) else {}

    return pl.pallas_call(
        kernel,
        out_shape=jax.ShapeDtypeStruct((b, h, i, j), out_dtype),
        grid_spec=grid_spec,
        input_output_aliases=aliases,
        compiler_params=pltpu.CompilerParams(
            dimension_semantics=("parallel", "parallel", "parallel", "parallel"),
            vmem_limit_bytes=vmem_limit),
    )(slopes, qk_dots)


# ---------------------- pure-JAX reference (torch forward) -------------------
def alibi_reference(qk_dots, *, heads):
    b, h, i, j = qk_dots.shape
    slopes = jnp.asarray(_get_alibi_slopes(heads), jnp.float32)
    i_arange = jnp.arange(j - i, j)
    j_arange = jnp.arange(j)
    bias = -jnp.abs(j_arange[None, None, :] - i_arange[None, :, None]).astype(jnp.float32)
    bias = bias * slopes[: min(h, heads), None, None]
    if h > heads:
        bias = jnp.concatenate([bias, jnp.zeros((h - heads, i, j), jnp.float32)], axis=0)
    return qk_dots + bias[None]


if __name__ == "__main__":
    key = jax.random.PRNGKey(0)
    k1, k2, k3 = jax.random.split(key, 3)

    # Case 1: qk heads == module heads; i != j exercises the arange(j-i, j)
    # offset; heads=6 exercises the non-power-of-2 slope path; J=128 keeps the
    # output lane-dense.
    B, HEADS, I, J = 2, 6, 16, 128
    qk = jax.random.normal(k1, (B, HEADS, I, J), dtype=jnp.float32)
    ref = alibi_reference(qk, ref_heads := HEADS, heads=HEADS) if False else alibi_reference(qk, heads=HEADS)
    out = alibi_positional_bias(qk, heads=HEADS)
    jax.block_until_ready(out)
    assert out.dtype == jnp.float32
    assert jnp.allclose(out, ref, rtol=1e-5, atol=1e-5), "case 1 mismatch"

    # Case 2: qk_dots has more heads than the module -> extra heads get zero bias.
    H2 = 8
    qk2 = jax.random.normal(k2, (B, H2, I, J), dtype=jnp.float32)
    ref2 = alibi_reference(qk2, heads=HEADS)
    out2 = alibi_positional_bias(qk2, heads=HEADS)
    jax.block_until_ready(out2)
    assert jnp.allclose(out2, ref2, rtol=1e-5, atol=1e-5), "case 2 mismatch"

    # Case 3: bf16 input promotes to f32 (torch semantics: qk + f32 bias).
    qk3 = jax.random.normal(k3, (B, HEADS, I, J), dtype=jnp.bfloat16)
    ref3 = alibi_reference(qk3, heads=HEADS)
    out3 = alibi_positional_bias(qk3, heads=HEADS)
    jax.block_until_ready(out3)
    assert out3.dtype == jnp.float32
    assert jnp.allclose(out3, ref3, rtol=1e-5, atol=1e-5), "case 3 mismatch"

    print("KERNEL_OK")
</pallas_src>

<mosaic_0001>
module attributes {stable_mosaic.version = 11 : i64} {
  func.func @_alibi_add_kernel(%arg0: i32, %arg1: i32, %arg2: i32, %arg3: i32, %arg4: memref<6xf32, #tpu.memory_space<smem>>, %arg5: memref<1x1x16x128xf32, #tpu.memory_space<vmem>>, %arg6: memref<1x1x16x128xf32, #tpu.memory_space<vmem>>) attributes {dimension_semantics = [#tpu.dimension_semantics<parallel>, #tpu.dimension_semantics<parallel>, #tpu.dimension_semantics<parallel>, #tpu.dimension_semantics<parallel>], iteration_bounds = array<i64: 2, 6, 1, 1>, scalar_prefetch = 0 : i64, scratch_operands = 0 : i64, tpu.core_type = #tpu.core_type<tc>, window_params = [{transform_indices = @transform_0, window_bounds = array<i64: 6>}, {transform_indices = @transform_1, window_bounds = array<i64: 1, 1, 16, 128>}, {transform_indices = @transform_2, window_bounds = array<i64: 1, 1, 16, 128>}]} {
    %0 = arith.index_cast %arg1 : i32 to index
    %1 = memref.load %arg4[%0] : memref<6xf32, #tpu.memory_space<smem>>
    %cst = arith.constant 0.000000e+00 : f32
    %2 = arith.subf %cst, %1 : f32
    %c128_i32 = arith.constant 128 : i32
    %3 = arith.muli %arg3, %c128_i32 : i32
    %c16_i32 = arith.constant 16 : i32
    %4 = arith.muli %arg2, %c16_i32 : i32
    %5 = arith.subi %3, %4 : i32
    %c112_i32 = arith.constant 112 : i32
    %6 = arith.subi %5, %c112_i32 : i32
    %7 = tpu.iota {dimensions = array<i32: 0>} : vector<16x128xi32>
    %8 = tpu.iota {dimensions = array<i32: 1>} : vector<16x128xi32>
    %9 = arith.subi %8, %7 : vector<16x128xi32>
    %10 = vector.broadcast %6 : i32 to vector<16x128xi32>
    %11 = arith.addi %9, %10 : vector<16x128xi32>
    %12 = math.absi %11 : vector<16x128xi32>
    %13 = arith.sitofp %12 : vector<16x128xi32> to vector<16x128xf32>
    %c0 = arith.constant 0 : index
    %c0_0 = arith.constant 0 : index
    %c0_1 = arith.constant 0 : index
    %c0_2 = arith.constant 0 : index
    %14 = vector.load %arg5[%c0, %c0_0, %c0_1, %c0_2] : memref<1x1x16x128xf32, #tpu.memory_space<vmem>>, vector<1x1x16x128xf32>
    %15 = vector.shape_cast %14 : vector<1x1x16x128xf32> to vector<16x128xf32>
    %16 = vector.broadcast %2 : f32 to vector<16x128xf32>
    %17 = arith.mulf %16, %13 : vector<16x128xf32>
    %18 = arith.addf %15, %17 : vector<16x128xf32>
    %c0_3 = arith.constant 0 : index
    %c0_4 = arith.constant 0 : index
    %c0_5 = arith.constant 0 : index
    %c0_6 = arith.constant 0 : index
    %19 = vector.load %arg6[%c0_3, %c0_4, %c0_5, %c0_6] : memref<1x1x16x128xf32, #tpu.memory_space<vmem>>, vector<1x1x16x128xf32>
    %20 = vector.shape_cast %19 : vector<1x1x16x128xf32> to vector<16x128xf32>
    %21 = vector.shape_cast %18 : vector<16x128xf32> to vector<1x1x16x128xf32>
    tpu.vector_store %arg6[%c0_3, %c0_4, %c0_5, %c0_6], %21 {strides = array<i32>} : memref<1x1x16x128xf32, #tpu.memory_space<vmem>>, vector<1x1x16x128xf32>,
    return
  }
  func.func @transform_0(%arg0: i32, %arg1: i32, %arg2: i32, %arg3: i32) -> i32 {
    %c0_i32 = arith.constant 0 : i32
    %c0_i32_0 = arith.constant 0 : i32
    return %c0_i32 : i32
  }
  func.func @transform_1(%arg0: i32, %arg1: i32, %arg2: i32, %arg3: i32) -> (i32, i32, i32, i32) {
    %c0_i32 = arith.constant 0 : i32
    return %arg0, %arg1, %arg2, %arg3 : i32, i32, i32, i32
  }
  func.func @transform_2(%arg0: i32, %arg1: i32, %arg2: i32, %arg3: i32) -> (i32, i32, i32, i32) {
    %c0_i32 = arith.constant 0 : i32
    return %arg0, %arg1, %arg2, %arg3 : i32, i32, i32, i32
  }
}

</mosaic_0001>

<bundles_post_ra>
// kernel: tpu_custom_call.1
= control target key start
LH: loop header
LB: loop body
LE: loop exit
PB: predicated region body
PF: predicated region fallthrough
CT: control target
= control target key end

     0   :  { %s854_s0 = inlined_call_operand.vmem [shape: f32[6], index: 0, kind: input, shape index: {}]   ;;  %s855_s1 = inlined_call_operand.hbm [shape: f32[2,6,16,128], index: 1, kind: input, shape index: {}, may-alias: {1,2}]   ;;  %s856_s2 = inlined_call_operand.hbm [shape: f32[2,6,16,128], index: 2, kind: output, shape index: {}, may-alias: {1,2}]  }
   0x1   :  { %866 = sst [smem:[#allocation16_spill]] %s854_s0 }
   0x2   :  { %7 = vsyncpa [#allocation5], 0 }
   0x3   :  { %8 = vsyncpa [#allocation3], 0 }
   0x4   :  { %10 = vsyncpa [#allocation3 + $0x1], 0 }
   0x5   :  { %11 = vsyncpa [#allocation4], 0 }
   0x6   :  { %13 = vsyncpa [#allocation4 + $0x1], 0  ;;  %s668_s9 = smov 0   ;;  %s670_s10 = smov 0  }
   0x7   :  { %s672_s11 = smov 0   ;;  %s674_s12 = smov 0  }
   0x8   :  { %s676_s13 = smov 0   ;;  %s678_s14 = smov 0  }
   0x9   :  { %s680_s15 = smov 0   ;;  %s682_s16 = smov 0  }
   0xa LB: > { %867 = sst [smem:[#allocation11_spill]] %s616_s9  ;;  %s387_s17 = sadd.s32 4294967295, %s644_s16   ;;  %s644_s16 = sphi %s682_s16, %s19_s16   ;;  %s640_s15 = sphi %s680_s15, %s894_s15   ;;  %s636_s14 = sphi %s678_s14, %s893_s14   ;;  %s632_s13 = sphi %s676_s13, %s892_s13   ;;  %s628_s12 = sphi %s674_s12, %s887_s12   ;;  %s624_s11 = sphi %s672_s11, %s891_s11   ;;  %s620_s10 = sphi %s670_s10, %s890_s10   ;;  %s616_s9 = sphi %s668_s9, %s889_s9  }
   0xb   : > { %868 = sst [smem:[#allocation12_spill]] %s636_s14  ;;  %s388_s18 = sadd.s32 4294967294, %s644_s16  }
   0xc   : > { %869 = sst [smem:[#allocation13_spill]] %s644_s16  ;;  %p86_p0 = scmp.ne.s32.totalorder %s624_s11, %s620_s10 }
   0xd   : > { %p87_p1 = scmp.eq.s32.totalorder %s644_s16, 0  ;;  %p92_p2 = scmp.ne.s32.totalorder %s620_s10, %s616_s9 }
   0xe   : > { %p716_p3 = scmp.eq.s32.totalorder %s387_s17, 0  ;;  %p122_p4 = scmp.eq.s32.totalorder %s387_s17, 11 }
   0xf   : > { %p88_p5 = por %p87_p1, %p86_p0  ;;  %p128_p6 = scmp.eq.s32.totalorder %s388_s18, 11 }
  0x10   : > { %p722_p7 = por %p716_p3, %p92_p2  ;;  %p726_p8 = por %p122_p4, %p86_p0 }
  0x11   : > { %p730_p9 = por %p128_p6, %p92_p2  ;;  %p389_p10 = scmp.ge.s32.totalorder %s644_s16, 1 }
  0x12   : > { %s871_s21 = scalar_select %p722_p7, 1, 0 }
  0x13   : > { %s872_s22 = scalar_select %p726_p8, 1, 0 }
  0x14   : > { %s873_s23 = scalar_select %p730_p9, 1, 0 }
  0x15   : > { %p135_p11 = scmp.lt.s32.totalorder %s644_s16, 13  ;;  %s875_s0 = sld [smem:[#allocation16_spill]] }
  0x16   : > { %874 = sst [smem:[#allocation14_spill]] %s873_s23  ;;  %p429_p13 = scmp.lt.s32.totalorder %s644_s16, 12 }
  0x17   : > { %p739_p12 = pnand %p389_p10, %p135_p11  ;;  %s41_s29 = sadd.s32 1, %s636_s14 }
  0x18   : > { %p746_p1 = pnand %p429_p13, %p88_p5 }
  0x19   : > { %s876_s27 = scalar_select %p739_p12, 1, 0 }
  0x1a   : > { %p416_p0 = pneg %p739_p12 }
  0x1b   : > { %s148_s26 = sshll.u32 %s875_s0, 4  ;;  %s149_s26 = int_to_ptr.vmem [resolvable:$true] %s148_s26 }
  0x1c   : > { %p417_p2 = pnand %p416_p0, %p716_p3  ;;  %s501_s30 = scalar_lea.vmem %s149_s26, 16 }
  0x1d   : > { %p502_p4 = scmp.ne.s32.totalorder %s149_s26, %s501_s30  ;;  %p509_p11 = scmp.lt.s32.totalorder %s149_s26, %s149_s26 }
  0x1e   : > { %p503_p6 = pneg %p417_p2  ;;  %p510_p8 = scmp.lt.s32.totalorder %s501_s30, %s501_s30 }
  0x20   : > { %p504_p9 = pnand %p503_p6, %p502_p4  ;;  %p511_p7 = por %p510_p8, %p509_p11 }
  0x22   : > { %p505_p10 = pneg %p504_p9 }
  0x24   : > { %p512_p12 = pnand %p511_p7, %p505_p10 }
  0x26   : > { %515 = shalt.err (!%p512_p12)
}
  0x27   : > { %s646_s3 = smov [#allocation2]   ;;  %p43_p5 = scmp.ge.s32.totalorder %s41_s29, 6 }
  0x28   : > { %419 = dma.vmem_to_smem (!%p417_p2), %s149_s26, 16, %s646_s3, [#allocation5]  }
  0x29   : > { %s45_s4 = sadd.s32 1, %s640_s15  ;;  %s159_s5 = sand.u32 1, %s624_s11  }
  0x2a   : > { %s393_s6 = sshll.u32 %s636_s14, 1  ;;  %s896_s29 = smov (%p43_p5, %s41_s29), 0 }
  0x2b   : > { %878 = sst [smem:[#allocation15_spill]] %s896_s29  ;;  %s898_s4 = smov (!%p43_p5, %s45_s4), %s640_s15 }
  0x2c   : > { %s71_s7 = ssub.s32 %s636_s14, %s896_s29  ;;  %p47_p7 = scmp.ge.s32.totalorder %s898_s4, 2 }
  0x2d   : > { %s392_s8 = sshll.u32 %s159_s5, 4  ;;  %s406_s17 = smul.u32 12, %s640_s15 }
  0x2e   : > { %s900_s4 = smov (%p47_p7, %s898_s4), 0  ;;  %s163_s24 = scalar_lea.vmem [#allocation6], %s392_s8 }
  0x2f   : > { %s172_s18 = sadd.s32 %s406_s17, %s393_s6  ;;  %s175_s25 = sshll.u32 %s163_s24, 4  ;;  %s176_s25 = int_to_ptr.vmem [resolvable:$true] %s175_s25 }
  0x30   : > { %s70_s26 = ssub.s32 %s640_s15, %s900_s4  ;;  %s394_s30 = sshll.u32 %s172_s18, 7 }
  0x31   : > { %s72_s3 = sor.u32 %s71_s7, %s70_s26  ;;  %s174_s23 = scalar_lea.hbm %s855_s1, %s394_s30 }
  0x32   : > { %p77_p8 = scmp.eq.s32.totalorder %s72_s3, 0  ;;  %s879_s29 = sadd.s32 1, %s624_s11 }
  0x33   : > { %s160_s9 = scalar_lea.sflag [#allocation3], %s159_s5  ;;  %p518_p9 = pneg %p746_p1 }
  0x34   : > { %s772_s14 = scalar_select %p77_p8, %s624_s11, %s879_s29  }
  0x35   : > { %s529_s16 = scalar_lea.vmem %s176_s25, 256  ;;  %s647_s6 = smov [#allocation6]  }
  0x36   : > { %p530_p12 = scmp.ne.s32.totalorder %s176_s25, %s529_s16  ;;  %s534_s8 = sshll.u32 %s647_s6, 4  ;;  %s535_s8 = int_to_ptr.vmem [resolvable:$false] %s534_s8 }
  0x37   : > { %s536_s7 = scalar_lea.vmem %s535_s8, 512  ;;  %p537_p2 = scmp.lt.s32.totalorder %s176_s25, %s535_s8 }
  0x38   : > { %p532_p13 = pnand %p530_p12, %p518_p9  ;;  %p538_p4 = scmp.lt.s32.totalorder %s536_s7, %s529_s16 }
  0x3a   : > { %p533_p0 = pneg %p532_p13  ;;  %p539_p6 = por %p538_p4, %p537_p2 }
  0x3c   : > { %p540_p10 = pnand %p539_p6, %p533_p0 }
  0x3e   : > { %543 = shalt.err (!%p540_p10)
}
  0x3f   : > { %s648_s0 = smov 128   ;;  %s649_s19 = smov 8  }
  0x40   : > { %423 = dma.hbm_to_vmem [thread:$0]  (!%p746_p1), %s174_s23, 256, %s176_s25, %s160_s9, %s648_s0, %s648_s0, %s649_s19  }
  0x41   : > { %p880_p11 = scmp.ne.s32.totalorder %s876_s27, 0 }
  0x43   : > { %187 = sbr.rel (%p880_p11) target bundleno = 113 (0x71), region = 28 }
  0x48   : > { %603 = dma.done.wait (%p716_p3), [#allocation5], 16  }
  0x49   : > { %605 = vsyncadd (%p716_p3), [#allocation5], 4294967280  ;;  %s785_s16 = sand.u32 1, %s620_s10   ;;  %p881_p5 = scmp.ne.s32.totalorder %s871_s21, 0 }
  0x4a   : > { %s397_s29 = sshll.u32 %s785_s16, 4  ;;  %s194_s5 = scalar_lea.sflag [#allocation3], %s785_s16 }
  0x4b   : > { %s197_s17 = scalar_lea.vmem [#allocation6], %s397_s29 }
  0x4c   : > { %607 = dma.done.wait (%p881_p5), %s194_s5, 256  }
  0x4d   : > { %609 = vsyncadd (%p881_p5), %s194_s5, 4294967040 }
  0x4e   : > { %202 = sfence }
  0x4f   : > { %s221_s9 = sld [smem:[#allocation2 + %s628_s12]]  ;;  %v227_v0 = vlaneseq  ;;  %s407_s23 = smul.u32 12, %s632_s13  ;;  %v245_v14 = vld [vmem:[%s197_s17] sm:$0xff]  ;;  %v246_v17 = vld [vmem:[%s197_s17 + $0x8] sm:$0xff] }
  0x50   : > { %s402_s27 = sshll.u32 %s628_s12, 1  ;;  %s218_s28 = scalar_lea.vmem [#allocation7], %s397_s29 }
  0x51   : > { %v228_v1 = vshrl.u32 %v227_v0, 7  ;;  %v231_v2 = vand.u32 127, %v227_v0  ;;  %s270_s21 = sadd.s32 %s407_s23, %s402_s27  ;;  %s273_s18 = sshll.u32 %s218_s28, 4  ;;  %s796_s18 = int_to_ptr.vmem [resolvable:$true] %s273_s18 }
  0x52   : > { %s403_s24 = sshll.u32 %s270_s21, 7  ;;  %s255_s26 = scalar_lea.sflag [#allocation4], %s785_s16 }
  0x53   : > { %v232_v3 = vsub.s32 %v231_v2, %v228_v1  ;;  %v229_v4 = vadd.s32 8, %v228_v1  ;;  %s801_s25 = scalar_lea.hbm %s856_s2, %s403_s24  ;;  %s544_s30 = scalar_lea.vmem %s796_s18, 256 }
  0x54   : > { %p545_p3 = scmp.ne.s32.totalorder %s796_s18, %s544_s30  ;;  %p882_p1 = scmp.ne.s32.totalorder %s872_s22, 0 }
  0x55   : > { %v235_v5 = vadd.s32 4294967184, %v232_v3  ;;  %v233_v6 = vsub.s32 %v231_v2, %v229_v4  ;;  %s222_s20 = ssub.f32 0.0, %s221_s9  ;;  %s650_s3 = smov [#allocation7]  }
  0x56   : > { %p546_p7 = pnand %p545_p3, %p882_p1  ;;  %s548_s6 = sshll.u32 %s650_s3, 4  ;;  %s549_s6 = int_to_ptr.vmem [resolvable:$false] %s548_s6 }
  0x57   : > { %v238_v7 = vsub.s32 0, %v235_v5  ;;  %v236_v8 = vadd.s32 4294967184, %v233_v6  ;;  %v247_v11 = vstv %s222_s20  ;;  %s550_s8 = scalar_lea.vmem %s549_s6, 512  ;;  %p551_p9 = scmp.lt.s32.totalorder %s796_s18, %s549_s6 }
  0x58   : > { %p547_p8 = pneg %p546_p7  ;;  %p552_p12 = scmp.lt.s32.totalorder %s550_s8, %s544_s30 }
  0x59   : > { %v399_v9 = vmin.u32 %v238_v7, %v235_v5  ;;  %v241_v10 = vsub.s32 0, %v236_v8 }
  0x5a   : > { %p553_p13 = por %p552_p12, %p551_p9 }
  0x5b   : > { %v243_v12 = vcvt.s32.f32 %v399_v9  ;;  %v400_v13 = vmin.u32 %v241_v10, %v236_v8 }
  0x5c   : > { %p554_p0 = pnand %p553_p13, %p547_p8 }
  0x5d   : > { %v248_v15 = vmul.f32 %v247_v11, %v243_v12  ;;  %v244_v16 = vcvt.s32.f32 %v400_v13 }
  0x5f   : > { %v250_v18 = vadd.f32 %v248_v15, %v245_v14  ;;  %v249_v19 = vmul.f32 %v247_v11, %v244_v16 }
  0x61   : > { %252 = vst [vmem:[%s218_s28] sm:$0xff] %v250_v18  ;;  %v251_v20 = vadd.f32 %v249_v19, %v246_v17 }
  0x63   : > { %253 = vst [vmem:[%s218_s28 + $0x8] sm:$0xff] %v251_v20 }
  0x64   : > { %557 = shalt.err (!%p554_p0)
}
  0x65   : > { %s558_s7 = scalar_lea.hbm %s801_s25, 256  ;;  %s562_s29 = scalar_lea.hbm %s856_s2, 3072 }
  0x66   : > { %p559_p2 = scmp.ne.s32.totalorder %s801_s25, %s558_s7  ;;  %p563_p10 = scmp.lt.s32.totalorder %s801_s25, %s856_s2 }
  0x67   : > { %p564_p11 = scmp.lt.s32.totalorder %s562_s29, %s558_s7 }
  0x68   : > { %p560_p4 = pnand %p559_p2, %p882_p1 }
  0x69   : > { %p565_p5 = por %p564_p11, %p563_p10 }
  0x6a   : > { %p561_p6 = pneg %p560_p4 }
  0x6c   : > { %p566_p3 = pnand %p565_p5, %p561_p6 }
  0x6e   : > { %569 = shalt.err (!%p566_p3)
}
  0x6f   : > { %s651_s9 = smov 128   ;;  %s652_s20 = smov 8  }
  0x70   : > { %414 = dma.vmem_to_hbm [thread:$0]  (%p882_p1), %s796_s18, 256, %s801_s25, %s255_s26, %s651_s9, %s651_s9, %s652_s20  }
  0x71 PF: > { %s883_s23 = sld [smem:[#allocation13_spill]] }
  0x72   : > { %s884_s27 = sld [smem:[#allocation11_spill]] }
  0x73   : > { %s885_s21 = sld [smem:[#allocation14_spill]] }
  0x77   : > { %p431_p7 = scmp.ge.s32.totalorder %s883_s23, 2 }
  0x78   : > { %s288_s28 = sand.u32 1, %s884_s27  }
  0x79   : > { %p886_p8 = scmp.ne.s32.totalorder %s885_s21, 0  ;;  %s289_s24 = scalar_lea.sflag [#allocation4], %s288_s28 }
  0x7b   : > { %p425_p9 = pnand %p431_p7, %p886_p8 }
  0x7d   : > { %p426_p12 = pneg %p425_p9 }
  0x7f   : > { %611 = dma.done.wait (%p426_p12), %s289_s24, 256  }
  0x80   : > { %613 = vsyncadd (%p426_p12), %s289_s24, 4294967040  ;;  %s19_s16 = sadd.s32 1, %s883_s23   ;;  %s887_s12 = sld [smem:[#allocation12_spill]] }
  0x81   : > { %p16_p13 = scmp.ge.s32.totalorder %s19_s16, 14   ;;  %s888_s22 = sld [smem:[#allocation15_spill]] }
  0x82   : > { %s889_s9 = smov %s620_s10  ;;  %s890_s10 = smov %s624_s11 }
  0x83   : > { %s891_s11 = smov %s772_s14  ;;  %s892_s13 = smov %s640_s15 }
  0x84   : > { %s894_s15 = smov %s900_s4  ;;  %18 = sbr.rel (!%p16_p13) target bundleno = 10 (0xa), region = 78 }
  0x87   : > { %s893_s14 = smov %s888_s22 }
  0x89   :  { %294 = vsyncpa [#allocation3], 1 }
  0x8a   :  { %296 = vsyncpa [#allocation3 + $0x1], 1 }
  0x8b   :  { %297 = vsyncpa [#allocation4], 1 }
  0x8c   :  { %299 = vsyncpa [#allocation4 + $0x1], 1 }
  0x8d   :  { %300 = vsyncpa [#allocation5], 1 }
  0x8e   :  { %302 = vsyncpa [#allocation5 + $0x1], 1 }

</bundles_post_ra>
